<compile_context>
chip_gen: v6e
topology: v6e:2x2x1
jax: 0.10.0
libtpu: 0.0.40
codegen_flags: <defaults>
</compile_context>

<pallas_src>
import math

import jax
import jax.numpy as jnp
from jax.experimental import pallas as pl
from jax.experimental.pallas import tpu as pltpu

_VMEM_LIMIT_BYTES = 32 * 1024 * 1024   # explicit scoped-VMEM budget (safe on v5e/v6e/v7x)
_PER_BLOCK_BYTES = 2 << 20             # ~2 MiB per (rows, tf) f32 block
_MXU_MAX_T = 512                       # dense-circulant MXU path when loop_len <= this


# ----------------------------------------------------------------------------
# Static gaussian taps (circular, truncated at r = ceil(3*sigma), renormalized).
# Expressed in jnp.roll convention: y = sum_s w[s] * roll(x, s, axis=0).
# ----------------------------------------------------------------------------
def _gaussian_taps(sigma, T):
    radius = max(1, int(math.ceil(3.0 * float(sigma))))
    offs = range(-radius, radius + 1)
    w = [math.exp(-0.5 * (d / float(sigma)) ** 2) for d in offs]
    norm = sum(w)
    taps = {}
    for d, wi in zip(offs, w):
        s = (-d) % T  # roll(x, s)[t] == x[(t + d) % T]
        taps[s] = taps.get(s, 0.0) + wi / norm
    return taps, radius


def _pick_feat_tile(F, rows, per_block_bytes=_PER_BLOCK_BYTES):
    """Largest lane-dense (multiple-of-128) tile dividing F that fits the per-block
    budget, preferring >= 2 grid points so v7x's two TensorCores both get work."""
    if F % 128 != 0:
        return F  # single full-feature block (block == full dim is always legal)
    budget = max(128, (per_block_bytes // (rows * 4)) // 128 * 128)
    divisors = [d for d in range(128, F + 1, 128) if F % d == 0 and d <= budget]
    if not divisors:
        return 128
    multi = [d for d in divisors if F // d >= 2]
    return max(multi) if multi else max(divisors)


# ----------------------------------------------------------------------------
# Smoothing path A (T <= _MXU_MAX_T): dense circulant on the MXU.
# ----------------------------------------------------------------------------
def _smooth_time_circulant_mxu(x2d, sigma):
    """y = W @ x with W the (T, T) circulant of the wrapped gaussian.  One MXU
    matmul per lane-dense feature tile.  The time axis is zero-padded to a
    multiple of 8 so arbitrary loop lengths stay sublane-aligned."""
    T, F = x2d.shape
    taps, _ = _gaussian_taps(sigma, T)
    items = sorted(taps.items())
    shifts = jnp.asarray([s for s, _ in items], dtype=jnp.int32)
    weights = jnp.asarray([w for _, w in items], dtype=jnp.float32)
    tapvec = jnp.zeros((T,), jnp.float32).at[shifts].add(weights)
    ij = (jnp.arange(T)[:, None] - jnp.arange(T)[None, :]) % T
    W = tapvec[ij]                       # W[t, j] = w[(t - j) % T]

    T8 = -(-T // 8) * 8                  # pad time to a multiple of 8
    if T8 != T:
        W = jnp.pad(W, ((0, T8 - T), (0, T8 - T)))
        x2d = jnp.pad(x2d, ((0, T8 - T), (0, 0)))

    tf = _pick_feat_tile(F, T8)

    def kernel(w_ref, x_ref, o_ref):
        # Default MXU precision is plenty for smoothed GAN latents.
        o_ref[...] = jnp.dot(w_ref[...], x_ref[...],
                             preferred_element_type=jnp.float32)

    out = pl.pallas_call(
        kernel,
        out_shape=jax.ShapeDtypeStruct((T8, F), jnp.float32),
        grid=(F // tf,),
        in_specs=[pl.BlockSpec((T8, T8), lambda i: (0, 0)),
                  pl.BlockSpec((T8, tf), lambda i: (0, i))],
        out_specs=pl.BlockSpec((T8, tf), lambda i: (0, i)),
        compiler_params=pltpu.CompilerParams(
            dimension_semantics=("parallel",),
            vmem_limit_bytes=_VMEM_LIMIT_BYTES),
    )(W, x2d)
    return out[:T]


# ----------------------------------------------------------------------------
# Smoothing path B (large T): banded circular roll filter (XLU + VPU).
# ----------------------------------------------------------------------------
def _smooth_time_rolls(x2d, sigma):
    """Weighted sum of the 2r+1 circularly shifted copies of (T, F), accumulated
    directly into o_ref, with symmetric shifts paired: o += w*(roll(+d)+roll(-d)).
    O(T*(2r+1)*F) work/bytes; no O(T^2) data is ever built."""
    T, F = x2d.shape
    taps, _ = _gaussian_taps(sigma, T)
    taps = dict(taps)
    w0 = taps.pop(0, 0.0)
    pairs, singles = [], []
    done = set()
    for s in sorted(taps):
        if s in done:
            continue
        s2 = (T - s) % T
        if s2 != s and s2 in taps:
            pairs.append((s, s2, 0.5 * (taps[s] + taps[s2])))  # symmetric => equal weights
            done.update((s, s2))
        else:
            singles.append((s, taps[s]))
            done.add(s)

    tf = _pick_feat_tile(F, T)

    def kernel(x_ref, o_ref):
        x = x_ref[...]
        o_ref[...] = w0 * x
        for s1, s2, w in pairs:          # static python loop -> fully unrolled
            o_ref[...] += w * (pltpu.roll(x, shift=s1, axis=0) +
                               pltpu.roll(x, shift=s2, axis=0))
        for s, w in singles:
            o_ref[...] += w * pltpu.roll(x, shift=s, axis=0)

    return pl.pallas_call(
        kernel,
        out_shape=jax.ShapeDtypeStruct((T, F), jnp.float32),
        grid=(F // tf,),
        in_specs=[pl.BlockSpec((T, tf), lambda i: (0, i))],
        out_specs=pl.BlockSpec((T, tf), lambda i: (0, i)),
        compiler_params=pltpu.CompilerParams(
            dimension_semantics=("parallel",),
            vmem_limit_bytes=_VMEM_LIMIT_BYTES),
    )(x2d)


def gaussian_smooth_time(latents, sigma, *, mxu_max_t=_MXU_MAX_T):
    """Circular gaussian filter along axis 0 of a (T, N, L) latent buffer."""
    T, N, L = latents.shape
    x2d = latents.reshape(T, N * L).astype(jnp.float32)
    if T <= mxu_max_t:
        out = _smooth_time_circulant_mxu(x2d, sigma)
    else:
        # TODO(synk): for very large, non-multiple-of-8 loop lengths the sublane
        # rolls lower to masked cross-vreg shuffles; a halo-padded slice variant
        # would be cheaper but is not implemented here.
        out = _smooth_time_rolls(x2d, sigma)
    return out.reshape(T, N, L)


# ----------------------------------------------------------------------------
# Plain-JAX glue (init-time only): linear time-resize a la F.interpolate.
# ----------------------------------------------------------------------------
def _linear_time_resize(x, new_len):
    """Mirrors F.interpolate(mode='linear', align_corners=False) along time."""
    T = x.shape[0]
    if T == new_len:
        return x
    pos = (jnp.arange(new_len, dtype=jnp.float32) + 0.5) * (T / float(new_len)) - 0.5
    pos = jnp.clip(pos, 0.0, T - 1)
    lo = jnp.floor(pos).astype(jnp.int32)
    hi = jnp.minimum(lo + 1, T - 1)
    frac = (pos - lo.astype(jnp.float32))[:, None, None]
    return x[lo] * (1.0 - frac) + x[hi] * frac


# ----------------------------------------------------------------------------
# Module wrapper mirroring LoopLatents semantics.
# ----------------------------------------------------------------------------
class LoopLatents:
    def __init__(self, latent_selection, loop_len, type="gaussian", smooth=10,
                 dtype=jnp.float32):
        latent_selection = jnp.asarray(latent_selection)
        K, N, L = latent_selection.shape
        if type == "gaussian":
            reps = max(1, round(loop_len / K))
            # torch.cat([lat.tile(reps, 1, 1) for lat in latent_selection])
            tiled = jnp.concatenate(
                [jnp.tile(latent_selection[k][None], (reps, 1, 1)) for k in range(K)],
                axis=0,
            )
            tiled = _linear_time_resize(tiled, loop_len)  # identity when reps*K == loop_len
            latents = gaussian_smooth_time(tiled, float(smooth))
        else:
            # TODO(synk): 'spline' (scipy splrep/splev fit) and 'slerp' construction
            # have no clean Pallas equivalent; only the 'gaussian' branch is implemented.
            raise NotImplementedError(type)
        # dtype=jnp.bfloat16 halves HBM traffic for consumers on v6e/v7x; f32 default
        # keeps the original torch precision.
        self.latents = latents.astype(dtype)
        self.index, self.length = 0, int(loop_len)

    def forward(self):
        # latents is already device-resident; a direct slice is cheaper than any
        # per-frame Pallas gather / prefetch cache (pure dispatch overhead).
        pos = self.index % self.length            # host-side modulo: no int32 overflow
        out = jax.lax.dynamic_slice_in_dim(self.latents, pos, 1, axis=0)  # (1, N, L)
        self.index += 1
        return out

    __call__ = forward

    def forward_batch(self, n):
        """Next n frames as one (n, N, L) array — amortizes per-frame dispatch for
        consumers that can take a batch."""
        pos = self.index % self.length
        idx = (pos + jnp.arange(n, dtype=jnp.int32)) % self.length
        self.index += n
        return jnp.take(self.latents, idx, axis=0)


# ----------------------------------------------------------------------------
if __name__ == "__main__":
    key = jax.random.PRNGKey(0)
    K, N_LAYERS, L_DIM = 4, 8, 128
    latent_selection = jax.random.normal(key, (K, N_LAYERS, L_DIM), dtype=jnp.float32)

    def reference_smooth(x, sigma):
        T = x.shape[0]
        radius = max(1, int(math.ceil(3.0 * sigma)))
        w = [math.exp(-0.5 * (d / sigma) ** 2) for d in range(-radius, radius + 1)]
        norm = sum(w)
        out = jnp.zeros_like(x)
        for j, d in enumerate(range(-radius, radius + 1)):
            out = out + (w[j] / norm) * jnp.roll(x, -d, axis=0)
        return out

    # --- Case 1: loop_len = 16 (multiple of 8) -> MXU circulant path. ---------
    LOOP_LEN, SMOOTH = 16, 2
    mod = LoopLatents(latent_selection, LOOP_LEN, type="gaussian", smooth=SMOOTH)
    jax.block_until_ready(mod.latents)
    reps = LOOP_LEN // K
    tiled = jnp.concatenate(
        [jnp.tile(latent_selection[k][None], (reps, 1, 1)) for k in range(K)], axis=0
    )
    ref = reference_smooth(tiled, float(SMOOTH))
    assert mod.latents.shape == (LOOP_LEN, N_LAYERS, L_DIM)
    # MXU-precision tolerant comparison (matmul may run reduced-precision passes).
    assert jnp.allclose(mod.latents, ref, atol=2e-2), "MXU circulant smoothing mismatch"

    # --- Case 2: force the roll-path kernel and check tightly. ----------------
    out_roll = gaussian_smooth_time(tiled, float(SMOOTH), mxu_max_t=0)
    jax.block_until_ready(out_roll)
    assert jnp.allclose(out_roll, ref, atol=1e-5), "roll smoothing mismatch"

    # --- Case 3: loop_len = 12 (NOT a multiple of 8): padded MXU path. --------
    mod12 = LoopLatents(latent_selection, 12, type="gaussian", smooth=SMOOTH)
    jax.block_until_ready(mod12.latents)
    tiled12 = jnp.concatenate(
        [jnp.tile(latent_selection[k][None], (3, 1, 1)) for k in range(K)], axis=0
    )
    ref12 = reference_smooth(tiled12, float(SMOOTH))
    assert mod12.latents.shape == (12, N_LAYERS, L_DIM)
    assert jnp.allclose(mod12.latents, ref12, atol=2e-2), "padded circulant mismatch"

    # --- forward() semantics across more than one loop. -----------------------
    for step in range(LOOP_LEN + 3):
        o = mod.forward()
        jax.block_until_ready(o)
        assert o.shape == (1, N_LAYERS, L_DIM)
        assert jnp.allclose(o[0], mod.latents[step % LOOP_LEN], atol=1e-6), (
            f"forward mismatch at step {step}"
        )

    # --- batched forward (single dispatch for many frames, with wrap). --------
    batch = jax.block_until_ready(mod12.forward_batch(15))
    assert batch.shape == (15, N_LAYERS, L_DIM)
    for i in range(15):
        assert jnp.allclose(batch[i], mod12.latents[i % 12], atol=1e-6), (
            f"forward_batch mismatch at frame {i}"
        )
    assert mod12.index == 15

    print("KERNEL_OK")
</pallas_src>

<mosaic_0001>
module attributes {stable_mosaic.version = 11 : i64} {
  func.func @kernel(%arg0: i32, %arg1: memref<16x16xf32, #tpu.memory_space<vmem>>, %arg2: memref<16x512xf32, #tpu.memory_space<vmem>>, %arg3: memref<16x512xf32, #tpu.memory_space<vmem>>) attributes {dimension_semantics = [#tpu.dimension_semantics<parallel>], iteration_bounds = array<i64: 2>, scalar_prefetch = 0 : i64, scratch_operands = 0 : i64, tpu.core_type = #tpu.core_type<tc>, window_params = [{pipeline_mode = #tpu.pipeline_mode<synchronous>, transform_indices = @transform_0, window_bounds = array<i64: 16, 16>}, {transform_indices = @transform_1, window_bounds = array<i64: 16, 512>}, {transform_indices = @transform_2, window_bounds = array<i64: 16, 512>}]} {
    %c0 = arith.constant 0 : index
    %c0_0 = arith.constant 0 : index
    %0 = vector.load %arg1[%c0, %c0_0] : memref<16x16xf32, #tpu.memory_space<vmem>>, vector<16x16xf32>
    %c0_1 = arith.constant 0 : index
    %c0_2 = arith.constant 0 : index
    %1 = vector.load %arg2[%c0_1, %c0_2] : memref<16x512xf32, #tpu.memory_space<vmem>>, vector<16x512xf32>
    %cst = arith.constant dense<0.000000e+00> : vector<16x512xf32>
    %2 = tpu.matmul %0, %1, %cst {dimension_numbers = #tpu.dot_dimension_numbers<[1], [0], [0], [1], [0, 0, 1, 1], [], []>} : vector<16x16xf32>, vector<16x512xf32>, vector<16x512xf32> -> vector<16x512xf32>
    %c0_3 = arith.constant 0 : index
    %c0_4 = arith.constant 0 : index
    %3 = vector.load %arg3[%c0_3, %c0_4] : memref<16x512xf32, #tpu.memory_space<vmem>>, vector<16x512xf32>
    tpu.vector_store %arg3[%c0_3, %c0_4], %2 {strides = array<i32>} : memref<16x512xf32, #tpu.memory_space<vmem>>, vector<16x512xf32>,
    return
  }
  func.func @transform_0(%arg0: i32) -> (i32, i32) {
    %c0_i32 = arith.constant 0 : i32
    %c0_i32_0 = arith.constant 0 : i32
    %c0_i32_1 = arith.constant 0 : i32
    return %c0_i32, %c0_i32_0 : i32, i32
  }
  func.func @transform_1(%arg0: i32) -> (i32, i32) {
    %c0_i32 = arith.constant 0 : i32
    %c0_i32_0 = arith.constant 0 : i32
    return %c0_i32, %arg0 : i32, i32
  }
  func.func @transform_2(%arg0: i32) -> (i32, i32) {
    %c0_i32 = arith.constant 0 : i32
    %c0_i32_0 = arith.constant 0 : i32
    return %c0_i32, %arg0 : i32, i32
  }
}

</mosaic_0001>

<bundles_post_ra>
// kernel: tpu_custom_call.1
= control target key start
LH: loop header
LB: loop body
LE: loop exit
PB: predicated region body
PF: predicated region fallthrough
CT: control target
= control target key end

     0   :  { %7 = vsyncpa [#allocation3], 0  ;;  %s883_s0 = inlined_call_operand.hbm [shape: f32[16,16], index: 0, kind: input, shape index: {}]   ;;  %s884_s1 = inlined_call_operand.hbm [shape: f32[16,1024], index: 1, kind: input, shape index: {}]   ;;  %s885_s2 = inlined_call_operand.hbm [shape: f32[16,1024], index: 2, kind: output, shape index: {}]  }
   0x1   :  { %8 = vsyncpa [#allocation6], 0 }
   0x2   :  { %10 = vsyncpa [#allocation6 + $0x1], 0 }
   0x3   :  { %11 = vsyncpa [#allocation4], 0 }
   0x4   :  { %13 = vsyncpa [#allocation4 + $0x1], 0  ;;  %s696_s9 = smov 0   ;;  %s698_s10 = smov 0  }
   0x5   :  { %s700_s11 = smov 0   ;;  %s702_s12 = smov 0  }
   0x6 LB: > { %s717_s13 = sadd.s32 4294967295, %s667_s12   ;;  %s457_s14 = sadd.s32 4294967294, %s667_s12   ;;  %s667_s12 = sphi %s702_s12, %s907_s12   ;;  %s663_s11 = sphi %s700_s11, %s906_s11   ;;  %s659_s10 = sphi %s698_s10, %s905_s10   ;;  %s655_s9 = sphi %s696_s9, %s904_s9  }
   0x7   : > { %s721_s15 = sadd.s32 1, %s667_s12   ;;  %s47_s16 = sadd.s32 1, %s663_s11 }
   0x8   : > { %s44_s17 = ssub.s32 %s667_s12, %s721_s15  ;;  %p54_p0 = scmp.ne.s32.totalorder %s663_s11, %s659_s10 }
   0x9   : > { %p45_p1 = scmp.eq.s32.totalorder %s44_s17, 0  ;;  %p55_p2 = scmp.eq.s32.totalorder %s667_s12, 0 }
   0xa   : > { %p60_p3 = scmp.ne.s32.totalorder %s659_s10, %s655_s9  ;;  %p889_p4 = scmp.eq.s32.totalorder %s717_s13, 0 }
   0xb   : > { %s733_s18 = scalar_select %p45_p1, %s663_s11, %s47_s16  }
   0xc   : > { %p735_p5 = por %p55_p2, %p54_p0  ;;  %p741_p6 = por %p889_p4, %p60_p3 }
   0xd   : > { %p84_p7 = scmp.eq.s32.totalorder %s717_s13, 1  ;;  %p90_p8 = scmp.eq.s32.totalorder %s457_s14, 1 }
   0xe   : > { %s891_s20 = scalar_select %p741_p6, 1, 0 }
   0xf   : > { %p458_p9 = scmp.ge.s32.totalorder %s667_s12, 1  ;;  %p97_p10 = scmp.lt.s32.totalorder %s667_s12, 3 }
  0x10   : > { %p748_p11 = por %p84_p7, %p54_p0  ;;  %p752_p12 = por %p90_p8, %p60_p3 }
  0x11   : > { %p756_p13 = pnand %p458_p9, %p97_p10  ;;  %s669_s24 = smov [#allocation2]  }
  0x12   : > { %s892_s21 = scalar_select %p748_p11, 1, 0 }
  0x13   : > { %s893_s22 = scalar_select %p752_p12, 1, 0 }
  0x14   : > { %s894_s23 = scalar_select %p756_p13, 1, 0 }
  0x15   : > { %p487_p1 = pneg %p756_p13  ;;  %s109_s25 = sshll.u32 %s669_s24, 4  ;;  %s110_s25 = int_to_ptr.vmem [resolvable:$true] %s109_s25 }
  0x16   : > { %p500_p3 = scmp.lt.s32.totalorder %s667_s12, 2  ;;  %s123_s27 = sand.u32 1, %s663_s11  }
  0x17   : > { %p764_p2 = pnand %p487_p1, %p889_p4  ;;  %s556_s28 = scalar_lea.vmem %s110_s25, 256 }
  0x18   : > { %p557_p8 = scmp.ne.s32.totalorder %s110_s25, %s556_s28  ;;  %p564_p12 = scmp.lt.s32.totalorder %s110_s25, %s110_s25 }
  0x19   : > { %p547_p7 = pneg %p764_p2  ;;  %p565_p11 = scmp.lt.s32.totalorder %s556_s28, %s556_s28 }
  0x1b   : > { %p559_p9 = pnand %p557_p8, %p547_p7  ;;  %p566_p6 = por %p565_p11, %p564_p12 }
  0x1d   : > { %p560_p10 = pneg %p559_p9 }
  0x1f   : > { %p567_p13 = pnand %p566_p6, %p560_p10 }
  0x21   : > { %570 = shalt.err (!%p567_p13)
}
  0x22   : > { %s670_s29 = smov 128   ;;  %s671_s30 = smov 8  }
  0x23   : > { %490 = dma.hbm_to_vmem [thread:$0]  (!%p764_p2), %s883_s0, 256, %s110_s25, [#allocation3], %s670_s29, %s670_s29, %s671_s30  }
  0x24   : > { %p782_p1 = pnand %p500_p3, %p735_p5  ;;  %s461_s6 = sshll.u32 %s123_s27, 6 }
  0x25   : > { %s477_s7 = sshll.u32 %s667_s12, 9  ;;  %s127_s17 = scalar_lea.vmem [#allocation5], %s461_s6 }
  0x26   : > { %s790_s16 = scalar_lea.hbm %s884_s1, %s477_s7  ;;  %s134_s24 = sshll.u32 %s127_s17, 4  ;;  %s792_s24 = int_to_ptr.vmem [resolvable:$true] %s134_s24 }
  0x27   : > { %s794_s19 = scalar_lea.sflag [#allocation6], %s123_s27  ;;  %s571_s25 = scalar_lea.hbm %s790_s16, 1024 }
  0x28   : > { %p572_p5 = scmp.ne.s32.totalorder %s790_s16, %s571_s25  ;;  %p573_p6 = pneg %p782_p1 }
  0x29   : > { %s576_s29 = scalar_lea.hbm %s884_s1, 2048  ;;  %p577_p13 = scmp.lt.s32.totalorder %s790_s16, %s884_s1 }
  0x2a   : > { %p574_p11 = pnand %p573_p6, %p572_p5  ;;  %p578_p2 = scmp.lt.s32.totalorder %s576_s29, %s571_s25 }
  0x2c   : > { %p575_p12 = pneg %p574_p11  ;;  %p579_p3 = por %p578_p2, %p577_p13 }
  0x2e   : > { %p580_p7 = pnand %p579_p3, %p575_p12 }
  0x30   : > { %583 = shalt.err (!%p580_p7)
}
  0x31   : > { %s584_s27 = scalar_lea.vmem %s792_s24, 1024  ;;  %s672_s4 = smov [#allocation5]  }
  0x32   : > { %p585_p8 = scmp.ne.s32.totalorder %s792_s24, %s584_s27  ;;  %s589_s6 = sshll.u32 %s672_s4, 4  ;;  %s590_s6 = int_to_ptr.vmem [resolvable:$false] %s589_s6 }
  0x33   : > { %s591_s7 = scalar_lea.vmem %s590_s6, 2048  ;;  %p592_p5 = scmp.lt.s32.totalorder %s792_s24, %s590_s6 }
  0x34   : > { %p587_p9 = pnand %p585_p8, %p573_p6  ;;  %p593_p11 = scmp.lt.s32.totalorder %s591_s7, %s584_s27 }
  0x36   : > { %p588_p10 = pneg %p587_p9  ;;  %p594_p0 = por %p593_p11, %p592_p5 }
  0x38   : > { %p595_p4 = pnand %p594_p0, %p588_p10 }
  0x3a   : > { %598 = shalt.err (!%p595_p4)
}
  0x3b   : > { %s673_s8 = smov 1024   ;;  %s674_s14 = smov 512  }
  0x3c   : > { %s675_s17 = smov 32   ;;  %p897_p6 = scmp.ne.s32.totalorder %s894_s23, 0 }
  0x3d   : > { %494 = dma.hbm_to_vmem [thread:$0]  (!%p782_p1), %s790_s16, 1024, %s792_s24, %s794_s19, %s673_s8, %s674_s14, %s675_s17  }
  0x3e   : > { %146 = sbr.rel (%p897_p6) target bundleno = 292 (0x124), region = 28  ;;  %p898_p12 = scmp.eq.s32.totalorder (!%p897_p6), %s717_s13, 0 }
  0x43   : > { %642 = dma.done.wait (%p898_p12), [#allocation3], 256   ;;  %p899_p13 = pmov %p898_p12 }
  0x44   : > { %s822_s25 = sand.u32 1, %s659_s10   ;;  %p900_p4 = scmp.ne.s32.totalorder %s891_s20, 0 }
  0x45   : > { %644 = vsyncadd (%p899_p13), [#allocation3], 4294967040  ;;  %s466_s26 = sshll.u32 %s822_s25, 6  ;;  %s153_s28 = scalar_lea.sflag [#allocation6], %s822_s25 }
  0x46   : > { %s156_s5 = scalar_lea.vmem [#allocation5], %s466_s26 }
  0x47   : > { %646 = dma.done.wait (%p900_p4), %s153_s28, 1024  }
  0x48   : > { %648 = vsyncadd (%p900_p4), %s153_s28, 4294966272  ;;  %v676_v0 = vmov 0.0   ;;  %v186_v1 = vld [vmem:[%s156_s5 + $0x28] sm:$0xff]  ;;  %v188_v2 = vld [vmem:[%s156_s5 + $0x38] sm:$0xff]  ;;  %vm189_vm0 = vcmask 130048   ;;  %s176_s20 = scalar_lea.vmem [#allocation7], %s466_s26 }
  0x49   : > { %260 = vmatprep.mubr.f32.mxu0 %v676_v0  ;;  %337 = vmatprep.mubr.f32.mxu1 %v676_v0  ;;  %v185_v3 = vld [vmem:[%s156_s5 + $0x20] sm:$0xff]  ;;  %v187_v4 = vld [vmem:[%s156_s5 + $0x30] sm:$0xff]  ;;  %v182_v5 = vld [vmem:[%s156_s5 + $0x8] sm:$0xff]  ;;  %s372_s23 = sshll.u32 %s176_s20, 4  ;;  %s478_s16 = sshll.u32 %s717_s13, 9  ;;  %s835_s23 = int_to_ptr.vmem [resolvable:$true] %s372_s23 }
  0x4a   : > { %224 = vmatprep.subr.mxu0 %v186_v1  ;;  %301 = vmatprep.subr.mxu1 %v188_v2  ;;  %v184_v6 = vld [vmem:[%s156_s5 + $0x18] sm:$0xff]  ;;  %v181_v7 = vld [vmem:[%s156_s5] sm:$0xff]  ;;  %v183_v8 = vld [vmem:[%s156_s5 + $0x10] sm:$0xff]  ;;  %s840_s29 = scalar_lea.hbm %s885_s2, %s478_s16  ;;  %s359_s13 = scalar_lea.sflag [#allocation4], %s822_s25 }
  0x4b   : > { %225 = vmatpush1.msra.mxu0 %v185_v3  ;;  %302 = vmatpush1.msra.mxu1 %v187_v4  ;;  %v179_v9 = vld [vmem:[#allocation2] sm:$0xff]  ;;  %v180_v10 = vld [vmem:[#allocation2 + $0x8] sm:$0xff]  ;;  %s599_s30 = scalar_lea.vmem %s835_s23, 1024  ;;  %p901_p1 = scmp.ne.s32.totalorder %s892_s21, 0 }
  0x4c   : > { %226 = vmatprep.subr.mxu0 %v182_v5  ;;  %303 = vmatprep.subr.mxu1 %v184_v6  ;;  %p600_p0 = scmp.ne.s32.totalorder %s835_s23, %s599_s30  ;;  %s677_s3 = smov [#allocation7]  }
  0x4d   : > { %227 = vmatpush1.msra.mxu0 %v181_v7  ;;  %304 = vmatpush1.msra.mxu1 %v183_v8  ;;  %s603_s27 = sshll.u32 %s677_s3, 4  ;;  %s604_s27 = int_to_ptr.vmem [resolvable:$false] %s603_s27 }
  0x4e   : > { %468 = vmatmul.mubr.msk.f32.vlgmr.msra.gmra.mxu0 %vm189_vm0, %v179_v9  ;;  %470 = vmatmul.mubr.msk.f32.vlgmr.msra.gmra.mxu1 %vm189_vm0, %v179_v9  ;;  %p601_p2 = pnand %p600_p0, %p901_p1  ;;  %s605_s4 = scalar_lea.vmem %s604_s27, 2048 }
  0x4f   : > { %266 = vmatprep.mubr.f32.mxu0 %v676_v0  ;;  %343 = vmatprep.mubr.f32.mxu1 %v676_v0  ;;  %p606_p7 = scmp.lt.s32.totalorder %s835_s23, %s604_s27  ;;  %p607_p8 = scmp.lt.s32.totalorder %s605_s4, %s599_s30 }
  0x50   : > { %p602_p3 = pneg %p601_p2 }
  0x51   : > { %p608_p9 = por %p607_p8, %p606_p7 }
  0x52   : > { %469 = vmatmul.mubr.msk.f32.gmra.mxu0 %vm189_vm0, %v180_v10  ;;  %471 = vmatmul.mubr.msk.f32.gmra.mxu1 %vm189_vm0, %v180_v10 }
  0x53   : > { %p609_p10 = pnand %p608_p9, %p602_p3 }
 0x10e   : > { %v262_v11 = vpop.f32.mrf.mxu0  ;;  %v339_v12 = vpop.f32.mrf.mxu1 }
 0x10f   : > { %350 = vst [vmem:[%s176_s20] sm:$0xff] %v262_v11  ;;  %352 = vst [vmem:[%s176_s20 + $0x10] sm:$0xff] %v339_v12 }
 0x110   : > { %v264_v13 = vpop.f32.mrf.mxu0  ;;  %v341_v14 = vpop.f32.mrf.mxu1 }
 0x111   : > { %351 = vst [vmem:[%s176_s20 + $0x8] sm:$0xff] %v264_v13  ;;  %353 = vst [vmem:[%s176_s20 + $0x18] sm:$0xff] %v341_v14 }
 0x112   : > { %v268_v15 = vpop.f32.mrf.mxu0  ;;  %v345_v16 = vpop.f32.mrf.mxu1 }
 0x113   : > { %354 = vst [vmem:[%s176_s20 + $0x20] sm:$0xff] %v268_v15  ;;  %356 = vst [vmem:[%s176_s20 + $0x30] sm:$0xff] %v345_v16 }
 0x114   : > { %v270_v17 = vpop.f32.mrf.mxu0  ;;  %v347_v18 = vpop.f32.mrf.mxu1 }
 0x115   : > { %355 = vst [vmem:[%s176_s20 + $0x28] sm:$0xff] %v270_v17  ;;  %357 = vst [vmem:[%s176_s20 + $0x38] sm:$0xff] %v347_v18 }
 0x116   : > { %612 = shalt.err (!%p609_p10)
}
 0x117   : > { %s613_s6 = scalar_lea.hbm %s840_s29, 1024  ;;  %s617_s14 = scalar_lea.hbm %s885_s2, 2048 }
 0x118   : > { %p614_p5 = scmp.ne.s32.totalorder %s840_s29, %s613_s6  ;;  %p618_p12 = scmp.lt.s32.totalorder %s840_s29, %s885_s2 }
 0x119   : > { %p619_p13 = scmp.lt.s32.totalorder %s617_s14, %s613_s6 }
 0x11a   : > { %p615_p11 = pnand %p614_p5, %p901_p1 }
 0x11b   : > { %p620_p4 = por %p619_p13, %p618_p12 }
 0x11c   : > { %p616_p6 = pneg %p615_p11 }
 0x11e   : > { %p621_p0 = pnand %p620_p4, %p616_p6 }
 0x120   : > { %624 = shalt.err (!%p621_p0)
}
 0x121   : > { %s678_s28 = smov 512   ;;  %s679_s5 = smov 1024  }
 0x122   : > { %s680_s20 = smov 32  }
 0x123   : > { %485 = dma.vmem_to_hbm [thread:$0]  (%p901_p1), %s835_s23, 1024, %s840_s29, %s359_s13, %s678_s28, %s679_s5, %s680_s20  }
 0x124 PF: > { %s387_s16 = sand.u32 1, %s655_s9   ;;  %p902_p2 = scmp.ne.s32.totalorder %s893_s22, 0 }
 0x125   : > { %p903_p3 = scmp.ge.s32.totalorder %s667_s12, 2  ;;  %s388_s24 = scalar_lea.sflag [#allocation4], %s387_s16 }
 0x127   : > { %p496_p7 = pnand %p903_p3, %p902_p2 }
 0x129   : > { %p497_p8 = pneg %p496_p7 }
 0x12b   : > { %650 = dma.done.wait (%p497_p8), %s388_s24, 1024  }
 0x12c   : > { %652 = vsyncadd (%p497_p8), %s388_s24, 4294966272  ;;  %p16_p9 = scmp.ge.s32.totalorder %s721_s15, 4   ;;  %s904_s9 = smov %s659_s10 }
 0x12d   : > { %s905_s10 = smov %s663_s11  ;;  %s906_s11 = smov %s733_s18 }
 0x12e   : > { %s907_s12 = smov %s721_s15  ;;  %18 = sbr.rel (!%p16_p9) target bundleno = 6 (0x6), region = 78 }
 0x133   :  { %393 = vsyncpa [#allocation3], 1 }
 0x134   :  { %395 = vsyncpa [#allocation3 + $0x1], 1 }
 0x135   :  { %396 = vsyncpa [#allocation6], 1 }
 0x136   :  { %398 = vsyncpa [#allocation6 + $0x1], 1 }
 0x137   :  { %399 = vsyncpa [#allocation4], 1 }
 0x138   :  { %401 = vsyncpa [#allocation4 + $0x1], 1 }

</bundles_post_ra>
